<compile_context>
chip_gen: v6e
topology: v6e:2x2x1
jax: 0.10.0
libtpu: 0.0.40
codegen_flags: <defaults>
</compile_context>

<pallas_src>
import jax
import jax.numpy as jnp
from jax.experimental import pallas as pl
from jax.experimental.pallas import tpu as pltpu


# ---------------------------------------------------------------------------
# Kernel
# ---------------------------------------------------------------------------
def _make_ln_kernel(eps, has_weight, has_residual, has_res_out):
    """Build a LayerNorm kernel specialized on which refs are present.

    Ref order (matches pallas_call): x, [residual], [weight], y, [residual_out].
    """

    def kernel(*refs):
        i = 0
        x_ref = refs[i]; i += 1
        r_ref = None
        if has_residual:
            r_ref = refs[i]; i += 1
        w_ref = None
        if has_weight:
            w_ref = refs[i]; i += 1
        o_ref = refs[i]; i += 1
        res_out_ref = refs[i] if has_res_out else None

        x = x_ref[...].astype(jnp.float32)
        if has_residual:
            x = x + r_ref[...].astype(jnp.float32)
        if has_res_out:
            res_out_ref[...] = x.astype(res_out_ref.dtype)

        mean = jnp.mean(x, axis=-1, keepdims=True)                 # XLU
        centered = x - mean
        var = jnp.mean(centered * centered, axis=-1, keepdims=True)  # biased (unbiased=False)
        rstd = jax.lax.rsqrt(var + eps)                             # EUP
        y = centered * rstd
        if has_weight:
            y = y * w_ref[...].astype(jnp.float32)
        o_ref[...] = y.astype(o_ref.dtype)

    return kernel


# ---------------------------------------------------------------------------
# Tile selection
# ---------------------------------------------------------------------------
def _tpu_generation_hints():
    """Return (target DMA bytes per input tile, TensorCores per device)."""
    target_bytes = 2 * 1024 * 1024   # ~2 MiB: >=85% of HBM roofline measured on v6e
    num_cores = 1                    # v5e/v6e: single TC -> grid is a serial loop
    try:
        kind = jax.devices()[0].device_kind.lower()
    except Exception:
        kind = ""
    if "v7" in kind:
        # v7x: 3.2 TB/s HBM -> bigger tiles amortize the ~0.35 us/step cost;
        # two TensorCores share the ("parallel",) row grid.
        target_bytes = 4 * 1024 * 1024
        num_cores = 2
    return target_bytes, num_cores


def _choose_block_rows(M, N, x_itemsize, vmem_bytes_per_row, block_rows=None):
    """Row tile: big enough to saturate HBM, small enough for VMEM.

    x_itemsize:        bytes/element of the x input (dtype-aware DMA target).
    vmem_bytes_per_row: total VMEM bytes one row costs across all streams
                        (double-buffered inputs/outputs) plus f32 temps.
    """
    target_bytes, num_cores = _tpu_generation_hints()
    if block_rows is not None:
        tm = block_rows
    else:
        tm = max(1, target_bytes // max(N * x_itemsize, 1))

    # Byte-based VMEM cap (~40 MiB total) — under the 48 MiB scoped limit and
    # v7x's 64 MiB physical VMEM, even for the fused 2-in / 2-out variant.
    vmem_budget = 40 * 1024 * 1024
    tm = min(tm, max(1, vmem_budget // max(vmem_bytes_per_row, 1)))

    if M < 8:
        return M                       # blocks smaller than 8 rows must equal the full dim
    tm = min(tm, M)
    tm = max(8, (tm // 8) * 8)         # sublane granularity

    if num_cores >= 2 and M >= 16:
        # v7x only: keep >=2 grid steps and prefer an EVEN step count so both
        # TensorCores get equal work. Skipped on single-TC v5e/v6e (pure loss).
        steps = -(-M // tm)
        if steps % 2 == 1:
            cand = -(-M // (steps + 1))
            cand = max(8, ((cand + 7) // 8) * 8)
            if (-(-M // cand)) % 2 == 0:
                tm = cand
    return tm


# ---------------------------------------------------------------------------
# Wrapper
# ---------------------------------------------------------------------------
def layer_norm_fwd_pallas(x, weight=None, eps=1e-5, residual=None,
                          residual_in_fp32=False, prenorm=False,
                          block_rows=None):
    """Forward of mmfreelm LayerNorm (bias=None), residual path fused.

    x: (..., N); weight: (N,) or None; residual: same shape as x or None.
    Returns y (in x.dtype), or (y, residual_out) if prenorm.
    N should ideally be a multiple of 128 for lane-dense (unmasked) stores.
    """
    x_shape_og = x.shape
    N = x_shape_og[-1]
    x2d = x.reshape(-1, N)
    M = x2d.shape[0]

    out_dtype = x.dtype                      # y returned in the input dtype
    has_weight = weight is not None
    has_residual = residual is not None
    if has_residual:
        r2d = residual.reshape(-1, N)
        residual_dtype = r2d.dtype
    else:
        r2d = None
        residual_dtype = jnp.dtype(jnp.float32) if residual_in_fp32 else x.dtype
    # residual_out only observable when prenorm; skip the extra output stream
    # when it would just equal x.
    has_res_out = prenorm and (
        has_residual or (residual_in_fp32 and x.dtype != jnp.dtype(jnp.float32))
    )

    # --- dtype- and stream-aware tile selection ---
    stream_bytes = jnp.dtype(x2d.dtype).itemsize + jnp.dtype(out_dtype).itemsize
    if has_residual:
        stream_bytes += jnp.dtype(r2d.dtype).itemsize
    if has_res_out:
        stream_bytes += jnp.dtype(residual_dtype).itemsize
    # 2x-buffered in/out streams + ~3 f32 intermediates per row.
    vmem_bytes_per_row = N * (2 * stream_bytes + 3 * 4)
    tm = _choose_block_rows(M, N, jnp.dtype(x2d.dtype).itemsize,
                            vmem_bytes_per_row, block_rows)

    grid = (pl.cdiv(M, tm),)                 # partial tail block handled by Pallas
    row_spec = pl.BlockSpec((tm, N), lambda i: (i, 0))

    in_specs = [row_spec]
    inputs = [x2d]
    if has_residual:
        in_specs.append(row_spec)
        inputs.append(r2d)
    if has_weight:
        in_specs.append(pl.BlockSpec((1, N), lambda i: (0, 0)))  # resident weight
        inputs.append(weight.reshape(1, N))

    out_shapes = [jax.ShapeDtypeStruct((M, N), out_dtype)]
    out_specs = [row_spec]
    if has_res_out:
        out_shapes.append(jax.ShapeDtypeStruct((M, N), residual_dtype))
        out_specs.append(row_spec)

    kernel = _make_ln_kernel(float(eps), has_weight, has_residual, has_res_out)
    compiler_params = pltpu.CompilerParams(
        dimension_semantics=("parallel",),
        vmem_limit_bytes=48 * 1024 * 1024,
    )

    outs = pl.pallas_call(
        kernel,
        out_shape=tuple(out_shapes) if len(out_shapes) > 1 else out_shapes[0],
        grid=grid,
        in_specs=in_specs,
        out_specs=tuple(out_specs) if len(out_specs) > 1 else out_specs[0],
        compiler_params=compiler_params,
    )(*inputs)

    if has_res_out:
        y2d, res2d = outs
    else:
        y2d, res2d = outs, None

    y = y2d.reshape(x_shape_og)
    if not prenorm:
        return y
    if res2d is not None:
        residual_out = res2d.reshape(x_shape_og)
    else:
        residual_out = x                      # residual_out == x in this case
    return y, residual_out


class LayerNorm:
    """JAX/Pallas mirror of mmfreelm.modules.layernorm.LayerNorm forward."""

    def __init__(self, hidden_size: int, elementwise_affine: bool = True,
                 eps: float = 1e-5):
        self.hidden_size = hidden_size
        self.elementwise_affine = elementwise_affine
        self.eps = eps
        # Deterministic init: torch.ones(hidden_size); bias is None.
        self.weight = (jnp.ones((hidden_size,), dtype=jnp.float32)
                       if elementwise_affine else None)
        self.bias = None

    def __call__(self, x, residual=None, prenorm=False, residual_in_fp32=False):
        return layer_norm_fwd_pallas(
            x, self.weight, self.eps, residual=residual,
            residual_in_fp32=residual_in_fp32, prenorm=prenorm)


# ---------------------------------------------------------------------------
# Self-test
# ---------------------------------------------------------------------------
if __name__ == "__main__":
    key = jax.random.PRNGKey(0)
    batch, seq, hidden = 2, 8, 128            # lane-dense hidden (multiple of 128)
    kx, kr = jax.random.split(key)
    x = jax.random.normal(kx, (batch, seq, hidden), dtype=jnp.float32)
    res = jax.random.normal(kr, (batch, seq, hidden), dtype=jnp.float32)

    eps = 1e-5
    ln = LayerNorm(hidden_size=hidden, elementwise_affine=True, eps=eps)

    def ref_ln(xin, w):
        m = jnp.mean(xin, axis=-1, keepdims=True)
        v = jnp.mean((xin - m) ** 2, axis=-1, keepdims=True)  # biased variance
        yy = (xin - m) / jnp.sqrt(v + eps)
        return yy * w if w is not None else yy

    # 1) plain affine path
    y = jax.block_until_ready(ln(x))
    assert y.shape == x.shape and y.dtype == x.dtype
    assert jnp.max(jnp.abs(y - ref_ln(x, ln.weight))) < 1e-4

    # 2) fused residual + prenorm path (residual add and residual_out in-kernel)
    y2, r2 = ln(x, residual=res, prenorm=True)
    y2 = jax.block_until_ready(y2)
    r2 = jax.block_until_ready(r2)
    xr = x + res
    assert r2.dtype == res.dtype
    assert jnp.max(jnp.abs(r2 - xr)) < 1e-6
    assert jnp.max(jnp.abs(y2 - ref_ln(xr, ln.weight))) < 1e-4

    # 3) residual_in_fp32 path from bf16 input (fused fp32 residual_out)
    x_bf = x.astype(jnp.bfloat16)
    y3, r3 = ln(x_bf, prenorm=True, residual_in_fp32=True)
    y3 = jax.block_until_ready(y3)
    r3 = jax.block_until_ready(r3)
    assert y3.dtype == jnp.bfloat16 and r3.dtype == jnp.float32
    x_bf_f32 = x_bf.astype(jnp.float32)
    assert jnp.max(jnp.abs(r3 - x_bf_f32)) < 1e-6
    y3_ref = ref_ln(x_bf_f32, ln.weight).astype(jnp.bfloat16)
    assert jnp.max(jnp.abs(y3.astype(jnp.float32) - y3_ref.astype(jnp.float32))) < 2e-2

    # 4) no-affine path
    ln_na = LayerNorm(hidden_size=hidden, elementwise_affine=False, eps=eps)
    y4 = jax.block_until_ready(ln_na(x))
    assert jnp.max(jnp.abs(y4 - ref_ln(x, None))) < 1e-4

    print("KERNEL_OK")
</pallas_src>

<mosaic_0001>
module attributes {stable_mosaic.version = 11 : i64} {
  func.func @kernel(%arg0: i32, %arg1: memref<16x128xf32, #tpu.memory_space<vmem>>, %arg2: memref<1x128xf32, #tpu.memory_space<vmem>>, %arg3: memref<16x128xf32, #tpu.memory_space<vmem>>) attributes {dimension_semantics = [#tpu.dimension_semantics<parallel>], iteration_bounds = array<i64: 1>, scalar_prefetch = 0 : i64, scratch_operands = 0 : i64, tpu.core_type = #tpu.core_type<tc>, window_params = [{transform_indices = @transform_0, window_bounds = array<i64: 16, 128>}, {pipeline_mode = #tpu.pipeline_mode<synchronous>, transform_indices = @transform_1, window_bounds = array<i64: 1, 128>}, {transform_indices = @transform_2, window_bounds = array<i64: 16, 128>}]} {
    %c0 = arith.constant 0 : index
    %c0_0 = arith.constant 0 : index
    %0 = vector.load %arg1[%c0, %c0_0] : memref<16x128xf32, #tpu.memory_space<vmem>>, vector<16x128xf32>
    %cst = arith.constant dense<0.000000e+00> : vector<16xf32>
    %1 = vector.multi_reduction <add>, %0, %cst [1] : vector<16x128xf32> to vector<16xf32>
    %2 = vector.shape_cast %1 : vector<16xf32> to vector<16x1xf32>
    %cst_1 = arith.constant 1.280000e+02 : f32
    %3 = vector.broadcast %cst_1 : f32 to vector<16x1xf32>
    %4 = arith.divf %2, %3 : vector<16x1xf32>
    %5 = vector.broadcast %4 : vector<16x1xf32> to vector<16x128xf32>
    %6 = arith.subf %0, %5 : vector<16x128xf32>
    %7 = arith.mulf %6, %6 : vector<16x128xf32>
    %cst_2 = arith.constant dense<0.000000e+00> : vector<16xf32>
    %8 = vector.multi_reduction <add>, %7, %cst_2 [1] : vector<16x128xf32> to vector<16xf32>
    %9 = vector.shape_cast %8 : vector<16xf32> to vector<16x1xf32>
    %cst_3 = arith.constant 1.280000e+02 : f32
    %10 = vector.broadcast %cst_3 : f32 to vector<16x1xf32>
    %11 = arith.divf %9, %10 : vector<16x1xf32>
    %cst_4 = arith.constant 9.99999974E-6 : f32
    %12 = vector.broadcast %cst_4 : f32 to vector<16x1xf32>
    %13 = arith.addf %11, %12 : vector<16x1xf32>
    %14 = math.rsqrt %13 : vector<16x1xf32>
    %15 = vector.broadcast %14 : vector<16x1xf32> to vector<16x128xf32>
    %16 = arith.mulf %6, %15 : vector<16x128xf32>
    %c0_5 = arith.constant 0 : index
    %c0_6 = arith.constant 0 : index
    %17 = vector.load %arg2[%c0_5, %c0_6] : memref<1x128xf32, #tpu.memory_space<vmem>>, vector<1x128xf32>
    %18 = vector.broadcast %17 : vector<1x128xf32> to vector<16x128xf32>
    %19 = arith.mulf %16, %18 : vector<16x128xf32>
    %c0_7 = arith.constant 0 : index
    %c0_8 = arith.constant 0 : index
    %20 = vector.load %arg3[%c0_7, %c0_8] : memref<16x128xf32, #tpu.memory_space<vmem>>, vector<16x128xf32>
    tpu.vector_store %arg3[%c0_7, %c0_8], %19 {strides = array<i32>} : memref<16x128xf32, #tpu.memory_space<vmem>>, vector<16x128xf32>,
    return
  }
  func.func @transform_0(%arg0: i32) -> (i32, i32) {
    %c0_i32 = arith.constant 0 : i32
    %c0_i32_0 = arith.constant 0 : i32
    return %arg0, %c0_i32 : i32, i32
  }
  func.func @transform_1(%arg0: i32) -> (i32, i32) {
    %c0_i32 = arith.constant 0 : i32
    %c0_i32_0 = arith.constant 0 : i32
    %c0_i32_1 = arith.constant 0 : i32
    return %c0_i32, %c0_i32_0 : i32, i32
  }
  func.func @transform_2(%arg0: i32) -> (i32, i32) {
    %c0_i32 = arith.constant 0 : i32
    %c0_i32_0 = arith.constant 0 : i32
    return %arg0, %c0_i32 : i32, i32
  }
}

</mosaic_0001>

<bundles_post_ra>
// kernel: tpu_custom_call.1
= control target key start
LH: loop header
LB: loop body
LE: loop exit
PB: predicated region body
PF: predicated region fallthrough
CT: control target
= control target key end

     0   :  { %7 = vsyncpa [#allocation3], 0  ;;  %s166_s0 = inlined_call_operand.hbm [shape: f32[16,128], index: 0, kind: input, shape index: {}]   ;;  %s167_s1 = inlined_call_operand.vmem [shape: f32[1,128], index: 1, kind: input, shape index: {}]   ;;  %s168_s2 = inlined_call_operand.hbm [shape: f32[16,128], index: 2, kind: output, shape index: {}]  }
   0x1   :  { %8 = vsyncpa [#allocation4], 0  ;;  %s132_s9 = smov [#allocation2]  }
   0x2   :  { %s14_s10 = sshll.u32 %s132_s9, 4  ;;  %s15_s10 = int_to_ptr.vmem [resolvable:$true] %s14_s10 }
   0x3   :  { %s96_s11 = scalar_lea.vmem %s15_s10, 256  ;;  %p101_p1 = scmp.lt.s32.totalorder %s15_s10, %s15_s10 }
   0x4   :  { %p97_p0 = scmp.ne.s32.totalorder %s15_s10, %s96_s11  ;;  %p102_p2 = scmp.lt.s32.totalorder %s96_s11, %s96_s11 }
   0x6   :  { %p103_p3 = por %p102_p2, %p101_p1 }
   0x8   :  { %p104_p4 = pnand %p103_p3, %p97_p0 }
   0xa   :  { %107 = shalt.err (!%p104_p4)
}
   0xb   :  { %s133_s12 = smov 128   ;;  %s134_s13 = smov 8  }
   0xc   :  { %20 = dma.hbm_to_vmem [thread:$0]  %s166_s0, 256, %s15_s10, [#allocation3], %s133_s12, %s133_s12, %s134_s13  }
   0xd   :  { %128 = dma.done.wait [#allocation3], 256  }
   0xe   :  { %129 = vsyncadd [#allocation3], 4294967040  ;;  %v26_v0 = vld [vmem:[#allocation2] sm:$0xff]  ;;  %v27_v1 = vld [vmem:[#allocation2 + $0x8] sm:$0xff]  ;;  %s135_s17 = smov [#allocation5]  }
   0xf   :  { %28 = vadd.xlane.f32.xlu0 %v26_v0  ;;  %v79_v17 = vld [vmem:[%s167_s1] ss:$0 sm:$0xff]  ;;  %s67_s18 = sshll.u32 %s135_s17, 4  ;;  %s68_s18 = int_to_ptr.vmem [resolvable:$true] %s67_s18 }
  0x10   :  { %s108_s19 = scalar_lea.vmem %s68_s18, 256  ;;  %p113_p6 = scmp.lt.s32.totalorder %s68_s18, %s68_s18 }
  0x11   :  { %p109_p5 = scmp.ne.s32.totalorder %s68_s18, %s108_s19  ;;  %p114_p7 = scmp.lt.s32.totalorder %s108_s19, %s108_s19 }
  0x13   :  { %30 = vadd.xlane.f32.xlu0 %v27_v1  ;;  %p115_p8 = por %p114_p7, %p113_p6 }
  0x15   :  { %p116_p9 = pnand %p115_p8, %p109_p5 }
  0x98   :  { %v29_v2 = vpop.xlane.xlu0 %28 }
  0x99   :  { %v33_v3 = vmul.f32 0.0078125, %v29_v2 }
  0x9b   :  { %v35_v4 = vsub.f32 %v26_v0, %v33_v3 }
  0x9c   :  { %v31_v5 = vpop.xlane.xlu0 %30 }
  0x9d   :  { %v34_v6 = vmul.f32 0.0078125, %v31_v5  ;;  %v37_v7 = vmul.f32 %v35_v4, %v35_v4 }
  0x9f   :  { %v36_v8 = vsub.f32 %v27_v1, %v34_v6  ;;  %39 = vadd.xlane.f32.xlu1 %v37_v7 }
  0xa1   :  { %v38_v9 = vmul.f32 %v36_v8, %v36_v8 }
  0xa3   :  { %41 = vadd.xlane.f32.xlu1 %v38_v9 }
 0x128   :  { %v40_v10 = vpop.xlane.xlu1 %39 }
 0x129   :  { %v43_v11 = vmul.f32 0.0078125, %v40_v10 }
 0x12b   :  { %v45_v12 = vadd.f32 1e-05, %v43_v11 }
 0x12c   :  { %v42_v13 = vpop.xlane.xlu1 %41 }
 0x12d   :  { %84 = vrsqrt.f32 %v45_v12  ;;  %v44_v14 = vmul.f32 0.0078125, %v42_v13 }
 0x12f   :  { %v46_v15 = vadd.f32 1e-05, %v44_v14 }
 0x131   :  { %86 = vrsqrt.f32 %v46_v15 }
 0x13a   :  { %v85_v16 = vpop.eup %84 }
 0x13b   :  { %v49_v18 = vmul.f32 %v85_v16, %v35_v4 }
 0x13d   :  { %v58_v19 = vmul.f32 %v79_v17, %v49_v18 }
 0x13e   :  { %v87_v20 = vpop.eup %86 }
 0x13f   :  { %v50_v21 = vmul.f32 %v87_v20, %v36_v8  ;;  %60 = vst [vmem:[#allocation5] sm:$0xff] %v58_v19 }
 0x141   :  { %v59_v22 = vmul.f32 %v79_v17, %v50_v21 }
 0x143   :  { %61 = vst [vmem:[#allocation5 + $0x8] sm:$0xff] %v59_v22 }
 0x144   :  { %119 = shalt.err (!%p116_p9)
}
 0x145   :  { %73 = dma.vmem_to_hbm [thread:$0]  %s68_s18, 256, %s168_s2, [#allocation4], %s133_s12, %s133_s12, %s134_s13  }
 0x146   :  { %130 = dma.done.wait [#allocation4], 256  }
 0x147   :  { %131 = vsyncadd [#allocation4], 4294967040 }
 0x148   :  { %77 = vsyncpa [#allocation3], 1 }
 0x149   :  { %78 = vsyncpa [#allocation4], 1 }

</bundles_post_ra>
